<compile_context>
chip_gen: v5e
topology: v5e:2x2
jax: 0.10.0
libtpu: 0.0.40
codegen_flags: <defaults>
</compile_context>

<pallas_src>
import functools

import jax
import jax.numpy as jnp
from jax.experimental import pallas as pl
from jax.experimental.pallas import tpu as pltpu


_ACTIVATIONS = {
    "relu": lambda x: jnp.maximum(x, 0.0),
    "tanh": jnp.tanh,
    "elu": lambda x: jnp.where(x > 0.0, x, jnp.expm1(x)),
    "gelu": lambda x: jax.nn.gelu(x, approximate=False),
    "identity": lambda x: x,
    "linear": lambda x: x,
}


def _determ_policy_kernel(obs_ref, w1_ref, b1_ref, w2_ref, b2_ref,
                          w3_ref, b3_ref, high_ref, low_ref, out_ref,
                          *, hidden_act, output_act):
    """One batch tile of the policy MLP.

    obs_ref : (TB, D)      w1: (D, H1)  b1: (1, H1)
                           w2: (H1, H2) b2: (1, H2)
                           w3: (H2, A)  b3: (1, A)
    high/low: (1, A)
    out_ref : (TB, A)
    """
    x = obs_ref[...]                                                       # (TB, D) f32

    # Hidden layers: Linear + activation (MXU matmuls, f32 accumulation).
    h1 = hidden_act(jnp.dot(x, w1_ref[...],
                            preferred_element_type=jnp.float32) + b1_ref[...])
    h2 = hidden_act(jnp.dot(h1, w2_ref[...],
                            preferred_element_type=jnp.float32) + b2_ref[...])

    # Output layer + output activation.
    z = output_act(jnp.dot(h2, w3_ref[...],
                           preferred_element_type=jnp.float32) + b3_ref[...])  # (TB, A)

    # action = (high - low)/2 * tanh(z) + (high + low)/2   (row broadcasts, VPU/EUP).
    high = high_ref[...]
    low = low_ref[...]
    out_ref[...] = ((high - low) * 0.5 * jnp.tanh(z)
                    + (high + low) * 0.5).astype(out_ref.dtype)


def _ceil_to(x, m):
    return ((x + m - 1) // m) * m


@functools.partial(
    jax.jit, static_argnames=("block_rows", "hidden_activation", "output_activation"))
def determ_policy_forward(obs, params, act_high_lim, act_low_lim, *,
                          block_rows=4096,
                          hidden_activation="relu",
                          output_activation="identity"):
    """obs: (B, obs_dim) f32 -> actions: (B, act_dim) f32."""
    w1, b1, w2, b2, w3, b3 = params
    B, D = obs.shape
    H1, H2 = w1.shape[1], w2.shape[1]
    A = w3.shape[1]

    hidden_act = _ACTIVATIONS[hidden_activation]
    output_act = _ACTIVATIONS[output_activation]

    high = act_high_lim.astype(jnp.float32).reshape(1, A)
    low = act_low_lim.astype(jnp.float32).reshape(1, A)

    # ---- Batch tiling (no padding copy: ragged edge blocks are masked by Mosaic).
    block_rows = max(128, _ceil_to(block_rows, 128))
    rows = _ceil_to(max(B, 8), 8)               # sublane-aligned logical batch
    if rows <= 1024:
        tb = min(block_rows, rows)              # small batch: 1 (or few) steps
    else:
        # Big batch: >=2 steps so v7x megacore can split tiles over both TCs,
        # each step large enough to amortize the ~0.35us/step pipeline overhead.
        n_steps = max(2, pl.cdiv(rows, block_rows))
        tb = min(block_rows, _ceil_to(pl.cdiv(rows, n_steps), 128))
    grid = pl.cdiv(B, tb)

    # ---- VMEM budget sized against the lane-padded tile footprint (8,128 tiling):
    # double-buffered obs/out streams + h1/h2/z intermediates + resident weights,
    # with a 2x margin. Floor 32 MiB (v5e default scoped limit is 16 MiB), cap
    # 64 MiB (v7x physical VMEM per TensorCore).
    lane = lambda n: _ceil_to(max(n, 1), 128)
    stream_bytes = 4 * tb * (2 * lane(D) + 3 * lane(A) + lane(H1) + lane(H2))
    weight_bytes = 4 * (_ceil_to(D, 8) * lane(H1) + _ceil_to(H1, 8) * lane(H2)
                        + _ceil_to(H2, 8) * lane(A)
                        + 8 * (lane(H1) + lane(H2) + 3 * lane(A)))
    vmem_limit = int(min(64 << 20, max(32 << 20, 2 * (stream_bytes + weight_bytes))))

    # Advisory cost for XLA's scheduler around the custom call.
    cost = pl.CostEstimate(
        flops=2 * B * (D * H1 + H1 * H2 + H2 * A) + 8 * B * A,
        transcendentals=B * A,
        bytes_accessed=4 * (B * D + B * A
                            + D * H1 + H1 + H1 * H2 + H2 + H2 * A + A + 2 * A))

    const = lambda a: pl.BlockSpec(a.shape, lambda i: (0,) * a.ndim)
    kernel = functools.partial(_determ_policy_kernel,
                               hidden_act=hidden_act, output_act=output_act)

    return pl.pallas_call(
        kernel,
        out_shape=jax.ShapeDtypeStruct((B, A), jnp.float32),
        grid=(grid,),
        in_specs=[pl.BlockSpec((tb, D), lambda i: (i, 0)),         # streamed obs tiles
                  const(w1), const(b1), const(w2), const(b2),      # VMEM-resident
                  const(w3), const(b3), const(high), const(low)],
        out_specs=pl.BlockSpec((tb, A), lambda i: (i, 0)),         # (B, A) directly
        compiler_params=pltpu.CompilerParams(
            dimension_semantics=("parallel",),   # v7x: shard batch tiles over 2 TCs
            vmem_limit_bytes=vmem_limit),
        cost_estimate=cost,
    )(obs, w1, b1, w2, b2, w3, b3, high, low)


def init_params(key, obs_dim, hidden_sizes, act_dim):
    """Uniform fan-in init (like torch.nn.Linear defaults).

    Weights stored as (in_features, out_features): x @ W + b is mathematically
    identical to torch's x @ W.T + b for its (out, in) storage.
    """
    sizes = [obs_dim] + list(hidden_sizes) + [act_dim]
    params = []
    for j in range(len(sizes) - 1):
        fan_in, fan_out = sizes[j], sizes[j + 1]
        key, kw, kb = jax.random.split(key, 3)
        bound = 1.0 / jnp.sqrt(fan_in)
        w = jax.random.uniform(kw, (fan_in, fan_out), jnp.float32, -bound, bound)
        b = jax.random.uniform(kb, (1, fan_out), jnp.float32, -bound, bound)
        params += [w, b]
    return tuple(params)


def _reference(obs, params, act_high_lim, act_low_lim):
    w1, b1, w2, b2, w3, b3 = params
    h1 = jnp.maximum(obs @ w1 + b1, 0.0)
    h2 = jnp.maximum(h1 @ w2 + b2, 0.0)
    z = h2 @ w3 + b3
    return ((act_high_lim - act_low_lim) / 2.0 * jnp.tanh(z)
            + (act_high_lim + act_low_lim) / 2.0)


if __name__ == "__main__":
    key = jax.random.PRNGKey(0)
    obs_dim, act_dim, hidden_sizes = 16, 2, (32, 32)

    k_obs, k_obs2, k_par = jax.random.split(key, 3)
    params = init_params(k_par, obs_dim, hidden_sizes, act_dim)
    act_high_lim = jnp.array([1.0, 2.0], jnp.float32)
    act_low_lim = jnp.array([-1.0, -0.5], jnp.float32)

    # Test 1: small batch (single tile).
    batch = 8
    obs = jax.random.normal(k_obs, (batch, obs_dim), jnp.float32)
    act = jax.block_until_ready(
        determ_policy_forward(obs, params, act_high_lim, act_low_lim))
    act_ref = _reference(obs, params, act_high_lim, act_low_lim)
    assert act.shape == (batch, act_dim), act.shape
    assert jnp.allclose(act, act_ref, atol=1e-5, rtol=1e-5), (act, act_ref)

    # Test 2: ragged multi-tile batch (exercises masked edge-block loads/stores;
    # no padding copy is made).
    batch2 = 300
    obs2 = jax.random.normal(k_obs2, (batch2, obs_dim), jnp.float32)
    act2 = jax.block_until_ready(
        determ_policy_forward(obs2, params, act_high_lim, act_low_lim,
                              block_rows=128))
    act2_ref = _reference(obs2, params, act_high_lim, act_low_lim)
    assert act2.shape == (batch2, act_dim), act2.shape
    assert jnp.allclose(act2, act2_ref, atol=1e-5, rtol=1e-5)

    print("KERNEL_OK")
</pallas_src>

<mosaic_0001>
module attributes {stable_mosaic.version = 11 : i64} {
  func.func @_determ_policy_kernel(%arg0: i32, %arg1: memref<8x16xf32, #tpu.memory_space<vmem>>, %arg2: memref<16x32xf32, #tpu.memory_space<vmem>>, %arg3: memref<1x32xf32, #tpu.memory_space<vmem>>, %arg4: memref<32x32xf32, #tpu.memory_space<vmem>>, %arg5: memref<1x32xf32, #tpu.memory_space<vmem>>, %arg6: memref<32x2xf32, #tpu.memory_space<vmem>>, %arg7: memref<1x2xf32, #tpu.memory_space<vmem>>, %arg8: memref<1x2xf32, #tpu.memory_space<vmem>>, %arg9: memref<1x2xf32, #tpu.memory_space<vmem>>, %arg10: memref<8x2xf32, #tpu.memory_space<vmem>>) attributes {dimension_semantics = [#tpu.dimension_semantics<parallel>], iteration_bounds = array<i64: 1>, scalar_prefetch = 0 : i64, scratch_operands = 0 : i64, tpu.core_type = #tpu.core_type<tc>, window_params = [{transform_indices = @transform_0, window_bounds = array<i64: 8, 16>}, {pipeline_mode = #tpu.pipeline_mode<synchronous>, transform_indices = @transform_1, window_bounds = array<i64: 16, 32>}, {pipeline_mode = #tpu.pipeline_mode<synchronous>, transform_indices = @transform_2, window_bounds = array<i64: 1, 32>}, {pipeline_mode = #tpu.pipeline_mode<synchronous>, transform_indices = @transform_3, window_bounds = array<i64: 32, 32>}, {pipeline_mode = #tpu.pipeline_mode<synchronous>, transform_indices = @transform_4, window_bounds = array<i64: 1, 32>}, {pipeline_mode = #tpu.pipeline_mode<synchronous>, transform_indices = @transform_5, window_bounds = array<i64: 32, 2>}, {pipeline_mode = #tpu.pipeline_mode<synchronous>, transform_indices = @transform_6, window_bounds = array<i64: 1, 2>}, {pipeline_mode = #tpu.pipeline_mode<synchronous>, transform_indices = @transform_7, window_bounds = array<i64: 1, 2>}, {pipeline_mode = #tpu.pipeline_mode<synchronous>, transform_indices = @transform_8, window_bounds = array<i64: 1, 2>}, {transform_indices = @transform_9, window_bounds = array<i64: 8, 2>}]} {
    %c0 = arith.constant 0 : index
    %c0_0 = arith.constant 0 : index
    %0 = vector.load %arg1[%c0, %c0_0] : memref<8x16xf32, #tpu.memory_space<vmem>>, vector<8x16xf32>
    %c0_1 = arith.constant 0 : index
    %c0_2 = arith.constant 0 : index
    %1 = vector.load %arg2[%c0_1, %c0_2] : memref<16x32xf32, #tpu.memory_space<vmem>>, vector<16x32xf32>
    %cst = arith.constant dense<0.000000e+00> : vector<8x32xf32>
    %2 = tpu.matmul %0, %1, %cst {dimension_numbers = #tpu.dot_dimension_numbers<[1], [0], [0], [1], [0, 0, 1, 1], [], []>} : vector<8x16xf32>, vector<16x32xf32>, vector<8x32xf32> -> vector<8x32xf32>
    %c0_3 = arith.constant 0 : index
    %c0_4 = arith.constant 0 : index
    %3 = vector.load %arg3[%c0_3, %c0_4] : memref<1x32xf32, #tpu.memory_space<vmem>>, vector<1x32xf32>
    %4 = vector.broadcast %3 : vector<1x32xf32> to vector<8x32xf32>
    %5 = arith.addf %2, %4 : vector<8x32xf32>
    %cst_5 = arith.constant 0.000000e+00 : f32
    %6 = vector.broadcast %cst_5 : f32 to vector<8x32xf32>
    %7 = arith.maximumf %5, %6 : vector<8x32xf32>
    %c0_6 = arith.constant 0 : index
    %c0_7 = arith.constant 0 : index
    %8 = vector.load %arg4[%c0_6, %c0_7] : memref<32x32xf32, #tpu.memory_space<vmem>>, vector<32x32xf32>
    %cst_8 = arith.constant dense<0.000000e+00> : vector<8x32xf32>
    %9 = tpu.matmul %7, %8, %cst_8 {dimension_numbers = #tpu.dot_dimension_numbers<[1], [0], [0], [1], [0, 0, 1, 1], [], []>} : vector<8x32xf32>, vector<32x32xf32>, vector<8x32xf32> -> vector<8x32xf32>
    %c0_9 = arith.constant 0 : index
    %c0_10 = arith.constant 0 : index
    %10 = vector.load %arg5[%c0_9, %c0_10] : memref<1x32xf32, #tpu.memory_space<vmem>>, vector<1x32xf32>
    %11 = vector.broadcast %10 : vector<1x32xf32> to vector<8x32xf32>
    %12 = arith.addf %9, %11 : vector<8x32xf32>
    %cst_11 = arith.constant 0.000000e+00 : f32
    %13 = vector.broadcast %cst_11 : f32 to vector<8x32xf32>
    %14 = arith.maximumf %12, %13 : vector<8x32xf32>
    %c0_12 = arith.constant 0 : index
    %c0_13 = arith.constant 0 : index
    %15 = vector.load %arg6[%c0_12, %c0_13] : memref<32x2xf32, #tpu.memory_space<vmem>>, vector<32x2xf32>
    %cst_14 = arith.constant dense<0.000000e+00> : vector<8x2xf32>
    %16 = tpu.matmul %14, %15, %cst_14 {dimension_numbers = #tpu.dot_dimension_numbers<[1], [0], [0], [1], [0, 0, 1, 1], [], []>} : vector<8x32xf32>, vector<32x2xf32>, vector<8x2xf32> -> vector<8x2xf32>
    %c0_15 = arith.constant 0 : index
    %c0_16 = arith.constant 0 : index
    %17 = vector.load %arg7[%c0_15, %c0_16] : memref<1x2xf32, #tpu.memory_space<vmem>>, vector<1x2xf32>
    %18 = vector.broadcast %17 : vector<1x2xf32> to vector<8x2xf32>
    %19 = arith.addf %16, %18 : vector<8x2xf32>
    %c0_17 = arith.constant 0 : index
    %c0_18 = arith.constant 0 : index
    %20 = vector.load %arg8[%c0_17, %c0_18] : memref<1x2xf32, #tpu.memory_space<vmem>>, vector<1x2xf32>
    %c0_19 = arith.constant 0 : index
    %c0_20 = arith.constant 0 : index
    %21 = vector.load %arg9[%c0_19, %c0_20] : memref<1x2xf32, #tpu.memory_space<vmem>>, vector<1x2xf32>
    %22 = arith.subf %20, %21 : vector<1x2xf32>
    %cst_21 = arith.constant 5.000000e-01 : f32
    %23 = vector.broadcast %cst_21 : f32 to vector<1x2xf32>
    %24 = arith.mulf %22, %23 : vector<1x2xf32>
    %25 = math.tanh %19 : vector<8x2xf32>
    %26 = vector.broadcast %24 : vector<1x2xf32> to vector<8x2xf32>
    %27 = arith.mulf %26, %25 : vector<8x2xf32>
    %28 = arith.addf %20, %21 : vector<1x2xf32>
    %cst_22 = arith.constant 5.000000e-01 : f32
    %29 = vector.broadcast %cst_22 : f32 to vector<1x2xf32>
    %30 = arith.mulf %28, %29 : vector<1x2xf32>
    %31 = vector.broadcast %30 : vector<1x2xf32> to vector<8x2xf32>
    %32 = arith.addf %27, %31 : vector<8x2xf32>
    %c0_23 = arith.constant 0 : index
    %c0_24 = arith.constant 0 : index
    %33 = vector.load %arg10[%c0_23, %c0_24] : memref<8x2xf32, #tpu.memory_space<vmem>>, vector<8x2xf32>
    tpu.vector_store %arg10[%c0_23, %c0_24], %32 {strides = array<i32>} : memref<8x2xf32, #tpu.memory_space<vmem>>, vector<8x2xf32>,
    return
  }
  func.func @transform_0(%arg0: i32) -> (i32, i32) {
    %c0_i32 = arith.constant 0 : i32
    %c0_i32_0 = arith.constant 0 : i32
    return %arg0, %c0_i32 : i32, i32
  }
  func.func @transform_1(%arg0: i32) -> (i32, i32) {
    %c0_i32 = arith.constant 0 : i32
    %c0_i32_0 = arith.constant 0 : i32
    %c0_i32_1 = arith.constant 0 : i32
    return %c0_i32, %c0_i32_0 : i32, i32
  }
  func.func @transform_2(%arg0: i32) -> (i32, i32) {
    %c0_i32 = arith.constant 0 : i32
    %c0_i32_0 = arith.constant 0 : i32
    %c0_i32_1 = arith.constant 0 : i32
    return %c0_i32, %c0_i32_0 : i32, i32
  }
  func.func @transform_3(%arg0: i32) -> (i32, i32) {
    %c0_i32 = arith.constant 0 : i32
    %c0_i32_0 = arith.constant 0 : i32
    %c0_i32_1 = arith.constant 0 : i32
    return %c0_i32, %c0_i32_0 : i32, i32
  }
  func.func @transform_4(%arg0: i32) -> (i32, i32) {
    %c0_i32 = arith.constant 0 : i32
    %c0_i32_0 = arith.constant 0 : i32
    %c0_i32_1 = arith.constant 0 : i32
    return %c0_i32, %c0_i32_0 : i32, i32
  }
  func.func @transform_5(%arg0: i32) -> (i32, i32) {
    %c0_i32 = arith.constant 0 : i32
    %c0_i32_0 = arith.constant 0 : i32
    %c0_i32_1 = arith.constant 0 : i32
    return %c0_i32, %c0_i32_0 : i32, i32
  }
  func.func @transform_6(%arg0: i32) -> (i32, i32) {
    %c0_i32 = arith.constant 0 : i32
    %c0_i32_0 = arith.constant 0 : i32
    %c0_i32_1 = arith.constant 0 : i32
    return %c0_i32, %c0_i32_0 : i32, i32
  }
  func.func @transform_7(%arg0: i32) -> (i32, i32) {
    %c0_i32 = arith.constant 0 : i32
    %c0_i32_0 = arith.constant 0 : i32
    %c0_i32_1 = arith.constant 0 : i32
    return %c0_i32, %c0_i32_0 : i32, i32
  }
  func.func @transform_8(%arg0: i32) -> (i32, i32) {
    %c0_i32 = arith.constant 0 : i32
    %c0_i32_0 = arith.constant 0 : i32
    %c0_i32_1 = arith.constant 0 : i32
    return %c0_i32, %c0_i32_0 : i32, i32
  }
  func.func @transform_9(%arg0: i32) -> (i32, i32) {
    %c0_i32 = arith.constant 0 : i32
    %c0_i32_0 = arith.constant 0 : i32
    return %arg0, %c0_i32 : i32, i32
  }
}

</mosaic_0001>

<bundles_post_ra>
// kernel: determ_policy_forward.1
= control target key start
LH: loop header
LB: loop body
LE: loop exit
PB: predicated region body
PF: predicated region fallthrough
CT: control target
= control target key end

     0   :  { %14 = vsyncpa [#allocation3], 0  ;;  %s347_s0 = inlined_call_operand.hbm [shape: f32[8,16], index: 0, kind: input, shape index: {}]   ;;  %s348_s1 = inlined_call_operand.hbm [shape: f32[16,32], index: 1, kind: input, shape index: {}]   ;;  %s349_s2 = inlined_call_operand.vmem [shape: f32[1,32], index: 2, kind: input, shape index: {}]   ;;  %s350_s3 = inlined_call_operand.vmem [shape: f32[32,32], index: 3, kind: input, shape index: {}]   ;;  %s351_s4 = inlined_call_operand.vmem [shape: f32[1,32], index: 4, kind: input, shape index: {}]   ;;  %s352_s5 = inlined_call_operand.vmem [shape: f32[32,2], index: 5, kind: input, shape index: {}]   ;;  %s353_s6 = inlined_call_operand.vmem [shape: f32[1,2], index: 6, kind: input, shape index: {}]   ;;  %s354_s7 = inlined_call_operand.vmem [shape: f32[1,2], index: 7, kind: input, shape index: {}]   ;;  %s355_s8 = inlined_call_operand.vmem [shape: f32[1,2], index: 8, kind: input, shape index: {}]   ;;  %s356_s9 = inlined_call_operand.vmem [shape: f32[8,2], index: 9, kind: output, shape index: {}]  }
   0x1   :  { %s21_s11 = sshll.u32 %s347_s0, 4  ;;  %s22_s11 = int_to_ptr.hbm [resolvable:$true] %s21_s11 }
   0x2   :  { %15 = vsyncpa [#allocation5], 0  ;;  %s245_s12 = smov [#allocation2]   ;;  %s31_s16 = sshll.u32 %s348_s1, 4  ;;  %s32_s16 = int_to_ptr.hbm [resolvable:$true] %s31_s16 }
   0x3   :  { %s23_s13 = sshll.u32 %s245_s12, 4  ;;  %s246_s17 = smov [#allocation4]   ;;  %s24_s13 = int_to_ptr.vmem [resolvable:$true] %s23_s13 }
   0x4   :  { %26 = dma.hbm_to_vmem [thread:$0]  %s22_s11, 128, %s24_s13, [#allocation3]  }
   0x5   :  { %s33_s18 = sshll.u32 %s246_s17, 4  ;;  %s247_s19 = smov 128   ;;  %s34_s18 = int_to_ptr.vmem [resolvable:$true] %s33_s18 }
   0x6   :  { %s248_s20 = smov 8  }
   0x7   :  { %39 = dma.hbm_to_vmem [thread:$0]  %s32_s16, 256, %s34_s18, [#allocation5], %s247_s19, %s247_s19, %s248_s20  }
   0x8   :  { %241 = dma.done.wait [#allocation3], 128  }
   0x9   :  { %242 = vsyncadd [#allocation3], 4294967168 }
   0xa   :  { %243 = dma.done.wait [#allocation5], 256  }
   0xb   :  { %244 = vsyncadd [#allocation5], 4294967040  ;;  %v64_v0 = vld [vmem:[#allocation4 + $0x8] sm:$0xff]  ;;  %v63_v1 = vld [vmem:[#allocation4] sm:$0xff]  ;;  %vm69_vm0 = vcmask 130048   ;;  %vm102_vm1 = vcmask 261120  }
   0xc   :  { %87 = vmatpush.msra.mxu0 %v64_v0  ;;  %v62_v2 = vld [vmem:[#allocation2] sm:$0xff]  ;;  %v97_v3 = vld [vmem:[%s350_s3 + $0x18] sm:$0xff]  ;;  %v96_v4 = vld [vmem:[%s350_s3 + $0x10] sm:$0xff]  ;;  %vm173_vm2 = vcmask 15360  }
   0xd   :  { %118 = vmatpush.msra.mxu1 %v97_v3  ;;  %v95_v5 = vld [vmem:[%s350_s3 + $0x8] sm:$0xff]  ;;  %v94_v6 = vld [vmem:[%s350_s3] sm:$0xff]  ;;  %v130_v7 = vld [vmem:[%s352_s5 + $0x18] sm:$0xff] }
   0xe   :  { %88 = vmatpush.msra.mxu0 %v63_v1  ;;  %150 = vmatpush.msra.mxu2 %v130_v7  ;;  %v188_v8 = vld [vmem:[%s349_s2] ss:$0 sm:$0xff]  ;;  %v129_v12 = vld [vmem:[%s352_s5 + $0x10] sm:$0xff]  ;;  %v128_v13 = vld [vmem:[%s352_s5 + $0x8] sm:$0xff] }
   0xf   :  { %181 = vmatmul.msk.f32.vlgmr.msra.gmra.mxu0 %vm69_vm0, %v62_v2  ;;  %119 = vmatpush.msra.mxu1 %v96_v4  ;;  %v127_v14 = vld [vmem:[%s352_s5] sm:$0xff] }
  0x10   :  { %151 = vmatpush.msra.mxu2 %v129_v12  ;;  %v189_v15 = vld [vmem:[%s351_s4] ss:$0 sm:$0xff] }
  0x11   :  { %120 = vmatpush.msra.mxu1 %v95_v5  ;;  %v158_v19 = vld [vmem:[%s354_s7] sm:$0x1] }
  0x12   :  { %152 = vmatpush.msra.mxu2 %v128_v13  ;;  %v159_v20 = vld [vmem:[%s355_s8] sm:$0x1] }
  0x13   :  { %121 = vmatpush.msra.mxu1 %v94_v6  ;;  %v190_v21 = vld [vmem:[%s353_s6] ss:$0 sm:$0xff]  ;;  %v160_v22 = vsub.f32 %v158_v19, %v159_v20  ;;  %v167_v24 = vadd.f32 %v159_v20, %v158_v19 }
  0x14   :  { %153 = vmatpush.msra.mxu2 %v127_v14 }
  0x15   :  { %v161_v26 = vmul.f32 0.5, %v160_v22  ;;  %v168_v27 = vmul.f32 0.5, %v167_v24 }
  0x17   :  { %v164_v28 = vperm.slane %v161_v26, 0  ;;  %v170_v29 = vperm.slane %v168_v27, 0 }
  0x8c   :  { %v90_v9 = vpop.f32.mrf.mxu0 }
  0x8d   :  { %v91_v10 = vadd.f32 %v188_v8, %v90_v9 }
  0x8f   :  { %v93_v11 = vmax.f32 %v91_v10, 0.0 }
  0x91   :  { %182 = vmatmul.msk.f32.vlgmr.msra.gmra.mxu1 %vm102_vm1, %v93_v11 }
 0x10e   :  { %v123_v16 = vpop.f32.mrf.mxu1 }
 0x10f   :  { %v124_v17 = vadd.f32 %v189_v15, %v123_v16 }
 0x111   :  { %v126_v18 = vmax.f32 %v124_v17, 0.0 }
 0x113   :  { %183 = vmatmul.msk.f32.vlgmr.msra.gmra.mxu2 %vm102_vm1, %v126_v18 }
 0x196   :  { %v155_v23 = vpop.f32.mrf.mxu2 }
 0x197   :  { %v156_v25 = vadd.f32 %v190_v21, %v155_v23 }
 0x199   :  { %191 = vtanh.f32 %v156_v25 }
 0x19f   :  { %v192_v30 = vpop.eup %191 }
 0x1a0   :  { %v166_v31 = vmul.f32 %v192_v30, %v164_v28 }
 0x1a2   :  { %v172_v32 = vadd.f32 %v170_v29, %v166_v31 }
 0x1a4   :  { %174 = vst.msk [vmem:[%s356_s9] sm:$0xff] %vm173_vm2, %v172_v32 }
 0x1a5   :  { %179 = vsyncpa [#allocation3], 1 }
 0x1a6   :  { %180 = vsyncpa [#allocation5], 1 }

</bundles_post_ra>
